<compile_context>
chip_gen: v7x
topology: tpu7x:2x2x1
jax: 0.10.0
libtpu: 0.0.40
codegen_flags: <defaults>
</compile_context>

<pallas_src>
import math
from functools import partial

import jax
import jax.numpy as jnp
from jax.experimental import pallas as pl
from jax.experimental.pallas import tpu as pltpu

LAMBDA_COS = 0.24
EXPONENT = 2.0
LANES = 128
MAX_TILE_R = 1024        # 1024 x 128 x f32 = 512 KiB per input buffer
NUM_SHARDS = 2           # megacore split on v7x; negligible cost on 1-TC chips
TWO_PI = 2.0 * math.pi


def _round_up(x, m):
    return (x + m - 1) // m * m


def _rotation_loss_kernel(p_ref, t_ref, o_ref, *, lambda_cos, exponent,
                          total_n, tile_r, n_inner):
    c = pl.program_id(0)   # shard index (parallel axis)
    i = pl.program_id(1)   # row-block within shard (reduction axis)

    @pl.when(i == 0)
    def _():
        o_ref[...] = jnp.zeros_like(o_ref)

    diff = p_ref[...].astype(jnp.float32) - t_ref[...].astype(jnp.float32)
    cos_term = (jnp.cos(diff * TWO_PI) - 1.0) * (-lambda_cos)
    if exponent == 2.0:
        pow_term = diff * diff          # avoid transcendental pow for default
    else:
        # Matches torch.pow: NaN for negative base with fractional exponent.
        pow_term = jnp.power(diff, exponent)
    loss_tile = cos_term + pow_term

    # Mask lane-pad / partial-block / overshoot-shard elements using the
    # logical (unclamped) global element index.  NOTE: int32 index math
    # limits this kernel to < 2^31 elements.
    blk = c * n_inner + i
    row_ids = jax.lax.broadcasted_iota(jnp.int32, (tile_r, LANES), 0)
    lane_ids = jax.lax.broadcasted_iota(jnp.int32, (tile_r, LANES), 1)
    gidx = (blk * tile_r + row_ids) * LANES + lane_ids
    loss_tile = jnp.where(gidx < total_n, loss_tile, 0.0)

    # Sublane-fold the (tile_r, 128) tile to one vreg shape and accumulate
    # element-wise into the resident output block (VALU only); the single
    # cross-lane reduction is deferred to the wrapper.
    folded = jnp.sum(loss_tile.reshape(-1, 8, LANES), axis=0, keepdims=True)
    o_ref[...] += folded


def rotation_loss(predict, target, lambda_cos=LAMBDA_COS, exponent=EXPONENT):
    assert predict.shape == target.shape
    total_n = predict.size

    # Lane-dense slab in the ORIGINAL dtype (no astype); reshape is free.
    flat_p = predict.reshape(-1)
    flat_t = target.reshape(-1)
    rem = total_n % LANES
    if rem:
        # Tail-only pad (rare path); padded elements are masked in-kernel.
        flat_p = jnp.pad(flat_p, (0, LANES - rem))
        flat_t = jnp.pad(flat_t, (0, LANES - rem))
    rows = flat_p.size // LANES
    p2 = flat_p.reshape(rows, LANES)
    t2 = flat_t.reshape(rows, LANES)

    # Tile / grid sizing.  tile_r is a multiple of 32 so the (sublane, lane)
    # tiling is legal for f32 / bf16 / int8 inputs and the in-kernel fold to
    # (8, 128) always divides evenly.
    tile_r = min(MAX_TILE_R, _round_up(rows, 32))
    n_row_blocks = pl.cdiv(rows, tile_r)
    num_shards = min(NUM_SHARDS, n_row_blocks)
    n_inner = pl.cdiv(n_row_blocks, num_shards)

    def in_map(c, i):
        # Clamp so overshoot blocks (fully masked in-kernel) never index OOB.
        return (jnp.minimum(c * n_inner + i, n_row_blocks - 1), 0)

    kernel = partial(_rotation_loss_kernel, lambda_cos=lambda_cos,
                     exponent=exponent, total_n=total_n, tile_r=tile_r,
                     n_inner=n_inner)

    partials = pl.pallas_call(
        kernel,
        out_shape=jax.ShapeDtypeStruct((num_shards, 8, LANES), jnp.float32),
        grid_spec=pltpu.PrefetchScalarGridSpec(
            num_scalar_prefetch=0,
            grid=(num_shards, n_inner),
            in_specs=[
                pl.BlockSpec((tile_r, LANES), in_map),
                pl.BlockSpec((tile_r, LANES), in_map),
            ],
            out_specs=pl.BlockSpec((1, 8, LANES), lambda c, i: (c, 0, 0)),
        ),
        compiler_params=pltpu.CompilerParams(
            dimension_semantics=("parallel", "arbitrary")),
    )(p2, t2)

    return jnp.sum(partials) / jnp.float32(total_n)


def rotation_loss_ref(predict, target, lambda_cos=LAMBDA_COS,
                      exponent=EXPONENT):
    diff = predict.astype(jnp.float32) - target.astype(jnp.float32)
    lt = (jnp.cos(diff * TWO_PI) - 1.0) * (-lambda_cos) + diff ** exponent
    return jnp.mean(lt)


if __name__ == "__main__":
    key = jax.random.PRNGKey(0)
    kp, kt = jax.random.split(key)
    shape = (2, 4, 16, 16)  # per-pixel rotation-coefficient maps, NCHW
    predict = jax.random.uniform(kp, shape, dtype=jnp.float32)
    target = jax.random.uniform(kt, shape, dtype=jnp.float32)

    loss = jax.block_until_ready(rotation_loss(predict, target))
    ref = jax.block_until_ready(rotation_loss_ref(predict, target))

    assert jnp.allclose(loss, ref, rtol=1e-5, atol=1e-6), (loss, ref)
    print("KERNEL_OK")
</pallas_src>

<mosaic_0001>
module attributes {stable_mosaic.version = 11 : i64} {
  func.func @_rotation_loss_kernel(%arg0: i32, %arg1: i32, %arg2: memref<32x128xf32, #tpu.memory_space<vmem>>, %arg3: memref<32x128xf32, #tpu.memory_space<vmem>>, %arg4: memref<1x8x128xf32, #tpu.memory_space<vmem>>) attributes {dimension_semantics = [#tpu.dimension_semantics<parallel>, #tpu.dimension_semantics<arbitrary>], iteration_bounds = array<i64: 1, 1>, scalar_prefetch = 0 : i64, scratch_operands = 0 : i64, tpu.core_type = #tpu.core_type<tc>, window_params = [{transform_indices = @transform_0, window_bounds = array<i64: 32, 128>}, {transform_indices = @transform_1, window_bounds = array<i64: 32, 128>}, {transform_indices = @transform_2, window_bounds = array<i64: 1, 8, 128>}]} {
    %c0_i32 = arith.constant 0 : i32
    %0 = arith.cmpi eq, %arg1, %c0_i32 : i32
    %1 = arith.extui %0 : i1 to i32
    %c0_i32_0 = arith.constant 0 : i32
    %2 = arith.cmpi ne, %1, %c0_i32_0 : i32
    scf.if %2 {
      %cst_14 = arith.constant 0.000000e+00 : f32
      %35 = vector.broadcast %cst_14 : f32 to vector<1x8x128xf32>
      %c0_15 = arith.constant 0 : index
      %c0_16 = arith.constant 0 : index
      %c0_17 = arith.constant 0 : index
      %36 = vector.load %arg4[%c0_15, %c0_16, %c0_17] : memref<1x8x128xf32, #tpu.memory_space<vmem>>, vector<1x8x128xf32>
      tpu.vector_store %arg4[%c0_15, %c0_16, %c0_17], %35 {strides = array<i32>} : memref<1x8x128xf32, #tpu.memory_space<vmem>>, vector<1x8x128xf32>,
    } else {
    }
    %c0 = arith.constant 0 : index
    %c0_1 = arith.constant 0 : index
    %3 = vector.load %arg2[%c0, %c0_1] : memref<32x128xf32, #tpu.memory_space<vmem>>, vector<32x128xf32>
    %c0_2 = arith.constant 0 : index
    %c0_3 = arith.constant 0 : index
    %4 = vector.load %arg3[%c0_2, %c0_3] : memref<32x128xf32, #tpu.memory_space<vmem>>, vector<32x128xf32>
    %5 = arith.subf %3, %4 : vector<32x128xf32>
    %cst = arith.constant 6.28318548 : f32
    %6 = vector.broadcast %cst : f32 to vector<32x128xf32>
    %7 = arith.mulf %5, %6 : vector<32x128xf32>
    %8 = math.cos %7 : vector<32x128xf32>
    %cst_4 = arith.constant 1.000000e+00 : f32
    %9 = vector.broadcast %cst_4 : f32 to vector<32x128xf32>
    %10 = arith.subf %8, %9 : vector<32x128xf32>
    %cst_5 = arith.constant -2.400000e-01 : f32
    %11 = vector.broadcast %cst_5 : f32 to vector<32x128xf32>
    %12 = arith.mulf %10, %11 : vector<32x128xf32>
    %13 = arith.mulf %5, %5 : vector<32x128xf32>
    %14 = arith.addf %12, %13 : vector<32x128xf32>
    %c1_i32 = arith.constant 1 : i32
    %15 = arith.muli %arg0, %c1_i32 : i32
    %16 = arith.addi %15, %arg1 : i32
    %17 = tpu.iota {dimensions = array<i32: 0>} : vector<32x128xi32>
    %18 = tpu.iota {dimensions = array<i32: 1>} : vector<32x128xi32>
    %c32_i32 = arith.constant 32 : i32
    %19 = arith.muli %16, %c32_i32 : i32
    %20 = vector.broadcast %19 : i32 to vector<32x128xi32>
    %21 = arith.addi %20, %17 : vector<32x128xi32>
    %c128_i32 = arith.constant 128 : i32
    %22 = vector.broadcast %c128_i32 : i32 to vector<32x128xi32>
    %23 = arith.muli %21, %22 : vector<32x128xi32>
    %24 = arith.addi %23, %18 : vector<32x128xi32>
    %c2048_i32 = arith.constant 2048 : i32
    %25 = vector.broadcast %c2048_i32 : i32 to vector<32x128xi32>
    %26 = arith.cmpi slt, %24, %25 : vector<32x128xi32>
    %cst_6 = arith.constant 0.000000e+00 : f32
    %27 = vector.broadcast %cst_6 : f32 to vector<32x128xf32>
    %28 = arith.select %26, %14, %27 : vector<32x128xi1>, vector<32x128xf32>
    %29 = vector.shape_cast %28 : vector<32x128xf32> to vector<4x8x128xf32>
    %cst_7 = arith.constant dense<0.000000e+00> : vector<8x128xf32>
    %30 = vector.multi_reduction <add>, %29, %cst_7 [0] : vector<4x8x128xf32> to vector<8x128xf32>
    %31 = vector.shape_cast %30 : vector<8x128xf32> to vector<1x8x128xf32>
    %c0_8 = arith.constant 0 : index
    %c0_9 = arith.constant 0 : index
    %c0_10 = arith.constant 0 : index
    %32 = vector.load %arg4[%c0_8, %c0_9, %c0_10] : memref<1x8x128xf32, #tpu.memory_space<vmem>>, vector<1x8x128xf32>
    %33 = arith.addf %32, %31 : vector<1x8x128xf32>
    %c0_11 = arith.constant 0 : index
    %c0_12 = arith.constant 0 : index
    %c0_13 = arith.constant 0 : index
    %34 = vector.load %arg4[%c0_11, %c0_12, %c0_13] : memref<1x8x128xf32, #tpu.memory_space<vmem>>, vector<1x8x128xf32>
    tpu.vector_store %arg4[%c0_11, %c0_12, %c0_13], %33 {strides = array<i32>} : memref<1x8x128xf32, #tpu.memory_space<vmem>>, vector<1x8x128xf32>,
    return
  }
  func.func @transform_0(%arg0: i32, %arg1: i32) -> (i32, i32) {
    %c1_i32 = arith.constant 1 : i32
    %0 = arith.muli %arg0, %c1_i32 : i32
    %1 = arith.addi %0, %arg1 : i32
    %c0_i32 = arith.constant 0 : i32
    %2 = arith.minsi %1, %c0_i32 : i32
    %c0_i32_0 = arith.constant 0 : i32
    %c0_i32_1 = arith.constant 0 : i32
    return %2, %c0_i32_0 : i32, i32
  }
  func.func @transform_1(%arg0: i32, %arg1: i32) -> (i32, i32) {
    %c1_i32 = arith.constant 1 : i32
    %0 = arith.muli %arg0, %c1_i32 : i32
    %1 = arith.addi %0, %arg1 : i32
    %c0_i32 = arith.constant 0 : i32
    %2 = arith.minsi %1, %c0_i32 : i32
    %c0_i32_0 = arith.constant 0 : i32
    %c0_i32_1 = arith.constant 0 : i32
    return %2, %c0_i32_0 : i32, i32
  }
  func.func @transform_2(%arg0: i32, %arg1: i32) -> (i32, i32, i32) {
    %c0_i32 = arith.constant 0 : i32
    %c0_i32_0 = arith.constant 0 : i32
    %c0_i32_1 = arith.constant 0 : i32
    return %arg0, %c0_i32, %c0_i32_0 : i32, i32, i32
  }
}

</mosaic_0001>

<bundles_post_ra>
// kernel: tpu_custom_call.1
= control target key start
LH: loop header
LB: loop body
LE: loop exit
PB: predicated region body
PF: predicated region fallthrough
CT: control target
= control target key end

     0   :  { %7 = vsyncpa [#allocation3], 0  ;;  %s1078_s0 = inlined_call_operand.hbm [shape: f32[16,128], index: 0, kind: input, shape index: {}]   ;;  %s1079_s1 = inlined_call_operand.hbm [shape: f32[16,128], index: 1, kind: input, shape index: {}]   ;;  %s1080_s2 = inlined_call_operand.hbm [shape: f32[1,8,128], index: 2, kind: output, shape index: {}]  }
   0x1   :  { %8 = vsyncpa [#allocation6], 0 }
   0x2   :  { %9 = vsyncpa [#allocation4], 0 }
   0x3   :  { %20 = vsyncadd [#allocation3], 256  ;;  %s713_s9 = smov [#allocation2]   ;;  %s641_s13 = scalar_lea.hbm %s1078_s0, 256 }
   0x4   :  { %s25_s10 = sshll.u32 %s713_s9, 4  ;;  %p642_p0 = scmp.ne.s32.totalorder %s1078_s0, %s641_s13  ;;  %s26_s10 = int_to_ptr.vmem [resolvable:$true] %s25_s10 }
   0x5   :  { %p645_p1 = scmp.lt.u32.totalorder %s641_s13, %s1078_s0 }
   0x7   :  { %p647_p2 = pnand %p645_p1, %p642_p0 }
   0x9   :  { %650 = shalt.err (!%p647_p2)
}
   0xa   :  { %s651_s18 = scalar_lea.vmem %s26_s10, 256  ;;  %s655_s19 = scalar_lea.vmem %s26_s10, 512 }
   0xb   :  { %p652_p3 = scmp.ne.s32.totalorder %s26_s10, %s651_s18  ;;  %p656_p4 = scmp.lt.s32.totalorder %s26_s10, %s26_s10 }
   0xc   :  { %p657_p5 = scmp.lt.s32.totalorder %s655_s19, %s651_s18 }
   0xe   :  { %p658_p6 = por %p657_p5, %p656_p4 }
  0x10   :  { %p659_p7 = pnand %p658_p6, %p652_p3 }
  0x12   :  { %662 = shalt.err (!%p659_p7)
}
  0x13   :  { %s714_s20 = smov 128   ;;  %s715_s21 = smov 8  }
  0x14   :  { %31 = dma.hbm_to_vmem [thread:$0]  %s1078_s0, 256, %s26_s10, [#allocation3], %s714_s20, %s714_s20, %s715_s21  }
  0x15   :  { %42 = vsyncadd [#allocation6], 256  ;;  %s716_s24 = smov [#allocation5]   ;;  %s663_s28 = scalar_lea.hbm %s1079_s1, 256 }
  0x16   :  { %s47_s25 = sshll.u32 %s716_s24, 4  ;;  %p664_p8 = scmp.ne.s32.totalorder %s1079_s1, %s663_s28  ;;  %s48_s25 = int_to_ptr.vmem [resolvable:$true] %s47_s25 }
  0x17   :  { %p667_p9 = scmp.lt.u32.totalorder %s663_s28, %s1079_s1 }
  0x19   :  { %p669_p10 = pnand %p667_p9, %p664_p8 }
  0x1b   :  { %672 = shalt.err (!%p669_p10)
}
  0x1c   :  { %s673_s5 = scalar_lea.vmem %s48_s25, 256  ;;  %s677_s0 = scalar_lea.vmem %s48_s25, 512 }
  0x1d   :  { %p674_p11 = scmp.ne.s32.totalorder %s48_s25, %s673_s5  ;;  %p678_p12 = scmp.lt.s32.totalorder %s48_s25, %s48_s25 }
  0x1e   :  { %p679_p13 = scmp.lt.s32.totalorder %s677_s0, %s673_s5 }
  0x20   :  { %p680_p0 = por %p679_p13, %p678_p12 }
  0x22   :  { %p681_p1 = pnand %p680_p0, %p674_p11 }
  0x24   :  { %684 = shalt.err (!%p681_p1)
}
  0x25   :  { %53 = dma.hbm_to_vmem [thread:$0]  %s1079_s1, 256, %s48_s25, [#allocation6], %s714_s20, %s714_s20, %s715_s21  }
  0x26   :  { %707 = dma.done.wait [#allocation3], 512  }
  0x27   :  { %708 = vsyncadd [#allocation3], 4294966784 }
  0x28   :  { %709 = dma.done.wait [#allocation6], 512  }
  0x29   :  { %710 = vsyncadd [#allocation6], 4294966784  ;;  %v77_v0 = vld [vmem:[#allocation2] sm:$0xff]  ;;  %v78_v1 = vld [vmem:[#allocation2 + $0x8] sm:$0xff]  ;;  %v717_v42 = vmov 683565275  }
  0x2a   :  { %v79_v2 = vld [vmem:[#allocation2 + $0x10] sm:$0xff]  ;;  %v81_v3 = vld [vmem:[#allocation5] sm:$0xff]  ;;  %v82_v4 = vld [vmem:[#allocation5 + $0x8] sm:$0xff]  ;;  %v718_v44 = vmov 2475754826   ;;  %s723_s1 = smov [#allocation7]  }
  0x2b   :  { %v83_v5 = vld [vmem:[#allocation5 + $0x10] sm:$0xff]  ;;  %v763_v6 = vsub.f32 %v77_v0, %v81_v3  ;;  %v765_v7 = vsub.f32 %v78_v1, %v82_v4  ;;  %v80_v24 = vld [vmem:[#allocation2 + $0x18] sm:$0xff]  ;;  %v719_v46 = vmov 2131351028   ;;  %v720_v48 = vmov 2102212464  }
  0x2c   :  { %v767_v8 = vsub.f32 %v79_v2, %v83_v5  ;;  %v84_v25 = vld [vmem:[#allocation5 + $0x18] sm:$0xff]  ;;  %v721_v50 = vmov 920167782   ;;  %v722_v58 = vmov 1326507024   ;;  %s563_s8 = sshll.u32 %s723_s1, 4  ;;  %s564_s8 = int_to_ptr.vmem [resolvable:$true] %s563_s8 }
  0x2d   :  { %v770_v9 = vmul.f32 6.2831855, %v763_v6  ;;  %v773_v10 = vmul.f32 6.2831855, %v765_v7  ;;  %v787_v31 = vsub.f32 %v80_v24, %v84_v25  ;;  %s685_s9 = scalar_lea.vmem %s564_s8, 128  ;;  %p690_p3 = scmp.lt.s32.totalorder %s564_s8, %s564_s8 }
  0x2e   :  { %v776_v11 = vmul.f32 6.2831855, %v767_v8  ;;  %p686_p2 = scmp.ne.s32.totalorder %s564_s8, %s685_s9  ;;  %p691_p4 = scmp.lt.s32.totalorder %s685_s9, %s685_s9 }
  0x2f   :  { %v93_v12 = vand.u32 2147483647, %v770_v9  ;;  %v96_v13 = vand.u32 2139095040, %v770_v9  ;;  %v196_v14 = vand.u32 2147483647, %v773_v10  ;;  %v199_v15 = vand.u32 2139095040, %v773_v10 }
  0x30   :  { %v302_v20 = vand.u32 2139095040, %v776_v11  ;;  %v299_v36 = vand.u32 2147483647, %v776_v11  ;;  %p692_p5 = por %p691_p4, %p690_p3 }
  0x31   :  { %v97_v16 = vshrl.u32 %v96_v13, 23  ;;  %v100_v17 = vand.u32 8388607, %v93_v12  ;;  %v200_v18 = vshrl.u32 %v199_v15, 23  ;;  %v203_v19 = vand.u32 8388607, %v196_v14 }
  0x32   :  { %v303_v23 = vshrl.u32 %v302_v20, 23  ;;  %p693_p6 = pnand %p692_p5, %p686_p2 }
  0x33   :  { %v577_v21 = vadd.s32 4294967169, %v97_v16  ;;  %v581_v22 = vadd.s32 4294967169, %v200_v18  ;;  %v101_v27 = vor.u32 8388608, %v100_v17  ;;  %v204_v28 = vor.u32 8388608, %v203_v19 }
  0x34   :  { %v585_v30 = vadd.s32 4294967169, %v303_v23 }
  0x35   :  { %v103_v26 = vadd.s32 1, %v577_v21  ;;  %v206_v29 = vadd.s32 1, %v581_v22  ;;  %v790_v37 = vshll.u32 %v101_v27, 8  ;;  %v792_v39 = vshll.u32 %v204_v28, 8 }
  0x36   :  { %v794_v40 = vadd.s32 1, %v585_v30 }
  0x37   :  { %vm104_vm0 = vcmp.gt.s32.totalorder %v103_v26, 0  ;;  %vm207_vm1 = vcmp.gt.s32.totalorder %v206_v29, 0 }
  0x38   :  { %v105_v32 = vsel %vm104_vm0, %v103_v26, 0  ;;  %v208_v35 = vsel %vm207_vm1, %v206_v29, 0  ;;  %vm310_vm6 = vcmp.gt.s32.totalorder %v794_v40, 0 }
  0x39   :  { %v106_v33 = vshrl.u32 %v105_v32, 5  ;;  %v107_v34 = vand.u32 31, %v105_v32  ;;  %v210_v38 = vand.u32 31, %v208_v35  ;;  %v801_v52 = vshrl.u32 %v208_v35, 5 }
  0x3b   :  { %v108_v41 = vsub.s32 32, %v107_v34  ;;  %v110_v43 = vshll.u32 %v717_v42, %v107_v34  ;;  %v113_v45 = vshll.u32 %v718_v44, %v107_v34  ;;  %v116_v47 = vshll.u32 %v719_v46, %v107_v34 }
  0x3c   :  { %v119_v49 = vshll.u32 %v720_v48, %v107_v34  ;;  %v122_v51 = vshll.u32 %v721_v50, %v107_v34  ;;  %vm125_vm2 = vcmp.lt.s32.totalorder %v106_v33, 1  ;;  %vm126_vm3 = vcmp.lt.s32.totalorder %v106_v33, 2 }
  0x3d   :  { %v109_v53 = vshrl.u32 %v717_v42, %v108_v41  ;;  %v111_v54 = vshrl.u32 %v718_v44, %v108_v41  ;;  %v114_v55 = vshrl.u32 %v719_v46, %v108_v41  ;;  %v117_v56 = vshrl.u32 %v720_v48, %v108_v41 }
  0x3e   :  { %v120_v57 = vshrl.u32 %v721_v50, %v108_v41  ;;  %v123_v59 = vshrl.u32 %v722_v58, %v108_v41  ;;  %vm128_vm4 = vcmp.lt.s32.totalorder %v106_v33, 4  ;;  %v211_v63 = vsub.s32 32, %v210_v38 }
  0x3f   :  { %v112_v60 = vor.u32 %v111_v54, %v110_v43  ;;  %v115_v61 = vor.u32 %v114_v55, %v113_v45  ;;  %v118_v62 = vor.u32 %v117_v56, %v116_v47  ;;  %vm127_vm5 = vcmp.lt.s32.totalorder %v106_v33, 3 }
  0x40   :  { %v121_v0 = vor.u32 %v120_v57, %v119_v49  ;;  %v124_v1 = vor.u32 %v123_v59, %v122_v51  ;;  %v213_v2 = vshll.u32 %v717_v42, %v210_v38  ;;  %v216_v18 = vshll.u32 %v718_v44, %v210_v38 }
  0x41   :  { %v129_v3 = vsel %vm125_vm2, %v109_v53, %v112_v60  ;;  %v130_v4 = vsel %vm128_vm4, %v118_v62, 2102212464  ;;  %v133_v5 = vsel %vm125_vm2, %v112_v60, %v115_v61  ;;  %v137_v13 = vsel %vm125_vm2, %v115_v61, %v118_v62 }
  0x42   :  { %v131_v15 = vsel %vm127_vm5, %v115_v61, %v130_v4  ;;  %v134_v16 = vsel %vm128_vm4, %v121_v0, 920167782  ;;  %v138_v17 = vsel %vm128_vm4, %v124_v1, 1326507024  ;;  %v212_v21 = vshrl.u32 %v717_v42, %v211_v63 }
  0x43   :  { %v135_v19 = vsel %vm127_vm5, %v118_v62, %v134_v16  ;;  %v139_v20 = vsel %vm127_vm5, %v121_v0, %v138_v17  ;;  %v214_v22 = vshrl.u32 %v718_v44, %v211_v63  ;;  %v132_v23 = vsel %vm126_vm3, %v129_v3, %v131_v15 }
  0x44   :  { %v136_v24 = vsel %vm126_vm3, %v133_v5, %v135_v19  ;;  %v140_v25 = vsel %vm126_vm3, %v137_v13, %v139_v20  ;;  %v217_v26 = vshrl.u32 %v719_v46, %v211_v63  ;;  %v219_v35 = vshll.u32 %v719_v46, %v210_v38 }
  0x45   :  { %v822_v27 = vmul.u32.u64.low %v790_v37, %v140_v25  ;;  %v823_v28 = vmul.u32.u64.high %v790_v37, %v140_v25, %v822_v27  ;;  %v826_v29 = vmul.u32.u64.low %v790_v37, %v136_v24  ;;  %v827_v30 = vmul.u32.u64.high %v790_v37, %v136_v24, %v826_v29 }
  0x46   :  { %v215_v32 = vor.u32 %v214_v22, %v213_v2  ;;  %v218_v34 = vor.u32 %v217_v26, %v216_v18  ;;  %v220_v41 = vshrl.u32 %v720_v48, %v211_v63  ;;  %v222_v33 = vshll.u32 %v720_v48, %v210_v38 }
  0x47   :  { %v223_v43 = vshrl.u32 %v721_v50, %v211_v63  ;;  %v225_v45 = vshll.u32 %v721_v50, %v210_v38  ;;  %v226_v47 = vshrl.u32 %v722_v58, %v211_v63  ;;  %v148_v49 = vmul.u32 %v790_v37, %v132_v23 }
  0x48   :  { %v221_v51 = vor.u32 %v220_v41, %v219_v35  ;;  %vm228_vm7 = vcmp.lt.s32.totalorder %v801_v52, 1  ;;  %vm229_vm8 = vcmp.lt.s32.totalorder %v801_v52, 2  ;;  %vm150_vm9 = vc.u32 %v823_v28, %v826_v29 }
  0x49   :  { %v151_v53 = vadd.s32 1, %v827_v30  ;;  %v224_v54 = vor.u32 %v223_v43, %v222_v33  ;;  %vm230_vm10 = vcmp.lt.s32.totalorder %v801_v52, 3  ;;  %v227_v55 = vor.u32 %v226_v47, %v225_v45 }
  0x4a   :  { %vm231_vm11 = vcmp.lt.s32.totalorder %v801_v52, 4  ;;  %v232_v38 = vsel %vm228_vm7, %v212_v21, %v215_v32  ;;  %v236_v56 = vsel %vm228_vm7, %v215_v32, %v218_v34  ;;  %v240_v60 = vsel %vm228_vm7, %v218_v34, %v221_v51 }
  0x4b   :  { %v152_v37 = vsel %vm150_vm9, %v151_v53, %v827_v30  ;;  %v233_v57 = vsel %vm231_vm11, %v221_v51, 2102212464  ;;  %v237_v59 = vsel %vm231_vm11, %v224_v54, 920167782  ;;  %v241_v0 = vsel %vm231_vm11, %v227_v55, 1326507024 }
  0x4c   :  { %v153_v61 = vadd.s32 %v152_v37, %v148_v49  ;;  %v234_v62 = vsel %vm230_vm10, %v218_v34, %v233_v57  ;;  %v238_v63 = vsel %vm230_vm10, %v221_v51, %v237_v59  ;;  %v242_v3 = vsel %vm230_vm10, %v224_v54, %v241_v0 }
  0x4d   :  { %v235_v1 = vsel %vm229_vm8, %v232_v38, %v234_v62  ;;  %v239_v2 = vsel %vm229_vm8, %v236_v56, %v238_v63  ;;  %v311_v4 = vsel %vm310_vm6, %v794_v40, 0  ;;  %v243_v13 = vsel %vm229_vm8, %v240_v60, %v242_v3 }
  0x4e   :  { %v154_v5 = vadd.s32 536870912, %v153_v61  ;;  %v855_v15 = vmul.u32.u64.low %v792_v39, %v239_v2  ;;  %v856_v16 = vmul.u32.u64.high %v792_v39, %v239_v2, %v855_v15  ;;  %v860_v17 = vmul.f32 6.2831855, %v787_v31 }
  0x4f   :  { %v863_v18 = vmul.u32.u64.low %v792_v39, %v243_v13  ;;  %v864_v19 = vmul.u32.u64.high %v792_v39, %v243_v13, %v863_v18  ;;  %v306_v20 = vand.u32 8388607, %v299_v36  ;;  %v313_v21 = vand.u32 31, %v311_v4 }
  0x50   :  { %v868_v40 = vshrl.u32 %v154_v5, 30  ;;  %v251_v52 = vmul.u32 %v792_v39, %v235_v1  ;;  %v254_v23 = vadd.s32 1, %v856_v16  ;;  %v405_v26 = vand.u32 2139095040, %v860_v17 }
  0x51   :  { %v314_v24 = vsub.s32 32, %v313_v21  ;;  %vm253_vm12 = vc.u32 %v864_v19, %v855_v15  ;;  %v307_v25 = vor.u32 8388608, %v306_v20  ;;  %v312_v32 = vshrl.u32 %v311_v4, 5 }
  0x52   :  { %v156_v22 = vshll.u32 %v868_v40, 30  ;;  %v255_v30 = vsel %vm253_vm12, %v254_v23, %v856_v16  ;;  %v316_v35 = vshll.u32 %v717_v42, %v313_v21  ;;  %v319_v41 = vshll.u32 %v718_v44, %v313_v21 }
  0x53   :  { %v256_v34 = vadd.s32 %v255_v30, %v251_v52  ;;  %v317_v39 = vshrl.u32 %v718_v44, %v314_v24  ;;  %v320_v43 = vshrl.u32 %v719_v46, %v314_v24  ;;  %v322_v45 = vshll.u32 %v719_v46, %v313_v21 }
  0x54   :  { %v157_v27 = vsub.s32 %v153_v61, %v156_v22  ;;  %v323_v47 = vshrl.u32 %v720_v48, %v314_v24  ;;  %v325_v51 = vshll.u32 %v720_v48, %v313_v21  ;;  %v884_v53 = vshll.u32 %v307_v25, 8 }
  0x55   :  { %v257_v49 = vadd.s32 536870912, %v256_v34  ;;  %v406_v54 = vshrl.u32 %v405_v26, 23  ;;  %v149_v55 = vadd.s32 %v826_v29, %v823_v28  ;;  %v315_v56 = vshrl.u32 %v717_v42, %v314_v24 }
  0x56   :  { %v159_v33 = vsub.s32 0, %v157_v27  ;;  %vm334_vm13 = vcmp.lt.s32.totalorder %v312_v32, 4  ;;  %v318_v57 = vor.u32 %v317_v39, %v316_v35  ;;  %v326_v59 = vshrl.u32 %v721_v50, %v314_v24 }
  0x57   :  { %v889_v37 = vshrl.u32 %v257_v49, 30  ;;  %v328_v60 = vshll.u32 %v721_v50, %v313_v21  ;;  %v321_v62 = vor.u32 %v320_v43, %v319_v41  ;;  %v324_v63 = vor.u32 %v323_v47, %v322_v45 }
  0x58   :  { %v578_v38 = vmin.u32 %v159_v33, %v157_v27  ;;  %v329_v0 = vshrl.u32 %v722_v58, %v314_v24  ;;  %v327_v2 = vor.u32 %v326_v59, %v325_v51  ;;  %vm331_vm14 = vcmp.lt.s32.totalorder %v312_v32, 1 }
  0x59   :  { %v259_v1 = vshll.u32 %v889_v37, 30  ;;  %vm333_vm15 = vcmp.lt.s32.totalorder %v312_v32, 3  ;;  %v336_v3 = vsel %vm334_vm13, %v324_v63, 2102212464  ;;  %v589_v4 = vadd.s32 4294967169, %v406_v54 }
  0x5a   :  { %v161_v61 = vclz %v578_v38  ;;  %v330_v29 = vor.u32 %v329_v0, %v328_v60  ;;  %vm332_vm0 = vcmp.lt.s32.totalorder %v312_v32, 2  ;;  %v335_v13 = vsel %vm331_vm14, %v315_v56, %v318_v57 }
  0x5b   :  { %v896_v5 = vsub.s32 %v256_v34, %v259_v1  ;;  %v340_v16 = vsel %vm334_vm13, %v327_v2, 920167782  ;;  %v339_v18 = vsel %vm331_vm14, %v318_v57, %v321_v62  ;;  %v337_v23 = vsel %vm333_vm15, %v321_v62, %v336_v3 }
  0x5c   :  { %v579_v28 = vadd.s32 4294967294, %v161_v61  ;;  %v341_v20 = vsel %vm333_vm15, %v324_v63, %v340_v16  ;;  %v344_v21 = vsel %vm334_vm13, %v330_v29, 1326507024  ;;  %v343_v24 = vsel %vm331_vm14, %v321_v62, %v324_v63 }
  0x5d   :  { %v262_v22 = vsub.s32 0, %v896_v5  ;;  %v345_v34 = vsel %vm333_vm15, %v327_v2, %v344_v21  ;;  %v342_v39 = vsel %vm332_vm0, %v339_v18, %v341_v20  ;;  %v402_v41 = vand.u32 2147483647, %v860_v17 }
  0x5e   :  { %vm580_vm1 = vcmp.lt.s32.totalorder %v579_v28, 0  ;;  %v338_v45 = vsel %vm332_vm0, %v335_v13, %v337_v23  ;;  %v346_v47 = vsel %vm332_vm0, %v343_v24, %v345_v34  ;;  %vm95_vm3 = vcmp.lt.s32.totalorder %v770_v9, 0 }
  0x5f   :  { %v164_v52 = vsel %vm580_vm1, 0, %v579_v28  ;;  %v582_v35 = vmin.u32 %v262_v22, %v896_v5  ;;  %v913_v51 = vmul.u32.u64.low %v884_v53, %v346_v47  ;;  %v914_v54 = vmul.u32.u64.high %v884_v53, %v346_v47, %v913_v51 }
  0x60   :  { %v165_v25 = vsub.s32 32, %v164_v52  ;;  %v166_v26 = vshll.u32 %v157_v27, %v164_v52  ;;  %v169_v30 = vsub.s32 4294967266, %v164_v52  ;;  %v412_v27 = vadd.s32 1, %v589_v4 }
  0x61   :  { %v264_v49 = vclz %v582_v35  ;;  %v917_v57 = vmul.u32.u64.low %v884_v53, %v342_v39  ;;  %v918_v59 = vmul.u32.u64.high %v884_v53, %v342_v39, %v917_v57  ;;  %v354_v63 = vmul.u32 %v884_v53, %v338_v45 }
  0x62   :  { %v167_v33 = vshrl.u32 %v149_v55, %v165_v25  ;;  %v170_v43 = vadd.s32 127, %v169_v30  ;;  %v179_v55 = vsub.s32 4, %v868_v40  ;;  %vm413_vm2 = vcmp.gt.s32.totalorder %v412_v27, 0 }
  0x63   :  { %v583_v60 = vadd.s32 4294967294, %v264_v49  ;;  %v414_v62 = vsel %vm413_vm2, %v412_v27, 0  ;;  %vm356_vm5 = vc.u32 %v914_v54, %v917_v57  ;;  %v409_v0 = vand.u32 8388607, %v402_v41 }
  0x64   :  { %v168_v38 = vor.u32 %v167_v33, %v166_v26  ;;  %v171_v56 = vshll.u32 %v170_v43, 23  ;;  %v357_v28 = vadd.s32 1, %v918_v59  ;;  %v416_v29 = vand.u32 31, %v414_v62 }
  0x65   :  { %vm584_vm4 = vcmp.lt.s32.totalorder %v583_v60, 0  ;;  %v180_v3 = vsel %vm95_vm3, %v179_v55, %v868_v40  ;;  %v252_v4 = vadd.s32 %v855_v15, %v864_v19  ;;  %vm937_vm6 = vcmp.le.f32.partialorder %v93_v12, 0.7853982 }
  0x66   :  { %v172_v32 = vor.u32 4788187, %v171_v56  ;;  %v175_v61 = vcvt.s32.f32 %v168_v38  ;;  %v267_v2 = vsel %vm584_vm4, 0, %v583_v60  ;;  %v358_v18 = vsel %vm356_vm5, %v357_v28, %v918_v59 }
  0x67   :  { %v272_v13 = vsub.s32 4294967266, %v267_v2  ;;  %v268_v16 = vsub.s32 32, %v267_v2  ;;  %v417_v20 = vsub.s32 32, %v416_v29  ;;  %v359_v52 = vadd.s32 %v358_v18, %v354_v63 }
  0x68   :  { %v173_v1 = vand.u32 2147483647, %v172_v32  ;;  %v410_v22 = vor.u32 8388608, %v409_v0  ;;  %v182_v40 = vsel %vm937_vm6, 0, %v180_v3  ;;  %v415_v15 = vshrl.u32 %v414_v62, 5 }
  0x69   :  { %v273_v24 = vadd.s32 127, %v272_v13  ;;  %v269_v19 = vshll.u32 %v896_v5, %v267_v2  ;;  %v360_v25 = vadd.s32 536870912, %v359_v52  ;;  %v419_v26 = vshll.u32 %v717_v42, %v416_v29 }
  0x6a   :  { %v176_v53 = vmul.f32 %v175_v61, %v173_v1  ;;  %v420_v30 = vshrl.u32 %v718_v44, %v417_v20  ;;  %v270_v34 = vshrl.u32 %v252_v4, %v268_v16  ;;  %v422_v35 = vshll.u32 %v718_v44, %v416_v29 }
  0x6b   :  { %v423_v39 = vshrl.u32 %v719_v46, %v417_v20  ;;  %v953_v43 = vshrl.u32 %v360_v25, 30  ;;  %v425_v5 = vshll.u32 %v719_v46, %v416_v29  ;;  %v426_v45 = vshrl.u32 %v720_v48, %v417_v20 }
  0x6c   :  { %v177_v23 = vxor.u32 2147483648, %v176_v53  ;;  %v274_v47 = vshll.u32 %v273_v24, 23  ;;  %v428_v49 = vshll.u32 %v720_v48, %v416_v29  ;;  %v429_v51 = vshrl.u32 %v721_v50, %v417_v20 }
  0x6d   :  { %v186_v44 = vand.u32 3, %v182_v40  ;;  %v362_v27 = vshll.u32 %v953_v43, 30  ;;  %v421_v38 = vor.u32 %v420_v30, %v419_v26  ;;  %v424_v56 = vor.u32 %v423_v39, %v422_v35 }
  0x6e   :  { %v178_v12 = vsel %vm95_vm3, %v177_v23, %v176_v53  ;;  %v430_v59 = vor.u32 %v429_v51, %v428_v49  ;;  %v431_v55 = vshll.u32 %v721_v50, %v416_v29  ;;  %v432_v60 = vshrl.u32 %v722_v58, %v417_v20 }
  0x6f   :  { %v181_v33 = vsel %vm937_vm6, %v770_v9, %v178_v12  ;;  %v271_v46 = vor.u32 %v270_v34, %v269_v19  ;;  %v962_v32 = vsub.s32 %v359_v52, %v362_v27  ;;  %v427_v61 = vor.u32 %v426_v45, %v425_v5 }
  0x70   :  { %625 = vcosq.f32 %v181_v33  ;;  %vm434_vm7 = vcmp.lt.s32.totalorder %v415_v15, 1  ;;  %v275_v62 = vor.u32 4788187, %v274_v47  ;;  %v418_v48 = vshrl.u32 %v717_v42, %v417_v20 }
  0x71   :  { %627 = vsinq.f32 %v181_v33  ;;  %vm437_vm8 = vcmp.lt.s32.totalorder %v415_v15, 4  ;;  %v365_v63 = vsub.s32 0, %v962_v32  ;;  %v433_v0 = vor.u32 %v432_v60, %v431_v55 }
  0x72   :  { %vm436_vm9 = vcmp.lt.s32.totalorder %v415_v15, 3  ;;  %v439_v1 = vsel %vm437_vm8, %v427_v61, 2102212464  ;;  %vm435_vm10 = vcmp.lt.s32.totalorder %v415_v15, 2  ;;  %v442_v50 = vsel %vm434_vm7, %v421_v38, %v424_v56 }
  0x73   :  { %v443_v58 = vsel %vm437_vm8, %v430_v59, 920167782  ;;  %v450_v2 = vshll.u32 %v410_v22, 8  ;;  %vm185_vm11 = vweird.f32 %v770_v9  ;;  %vm188_vm12 = vcmp.eq.s32.totalorder %v186_v44, 0 }
  0x74   :  { %v278_v28 = vcvt.s32.f32 %v271_v46  ;;  %v586_v29 = vmin.u32 %v365_v63, %v962_v32  ;;  %v438_v42 = vsel %vm434_vm7, %v418_v48, %v421_v38  ;;  %v440_v3 = vsel %vm436_vm9, %v424_v56, %v439_v1 }
  0x75   :  { %v444_v4 = vsel %vm436_vm9, %v427_v61, %v443_v58  ;;  %v446_v13 = vsel %vm434_vm7, %v424_v56, %v427_v61  ;;  %v276_v53 = vand.u32 2147483647, %v275_v62  ;;  %v447_v20 = vsel %vm437_vm8, %v433_v0, 1326507024 }
  0x76   :  { %v367_v16 = vclz %v586_v29  ;;  %v445_v18 = vsel %vm435_vm10, %v442_v50, %v444_v4  ;;  %vm191_vm13 = vcmp.eq.s32.totalorder %v186_v44, 2  ;;  %v448_v52 = vsel %vm436_vm9, %v430_v59, %v447_v20 }
  0x77   :  { %v978_v22 = vmul.u32.u64.low %v450_v2, %v445_v18  ;;  %v979_v23 = vmul.u32.u64.high %v450_v2, %v445_v18, %v978_v22  ;;  %v441_v25 = vsel %vm435_vm10, %v438_v42, %v440_v3  ;;  %v449_v26 = vsel %vm435_vm10, %v446_v13, %v448_v52 }
  0x78   :  { %v587_v19 = vadd.s32 4294967294, %v367_v16  ;;  %vm187_vm14 = vcmp.lt.s32.totalorder %v186_v44, 2  ;;  %v984_v12 = vmul.u32.u64.low %v450_v2, %v449_v26  ;;  %v985_v34 = vmul.u32.u64.high %v450_v2, %v449_v26, %v984_v12 }
  0x79   :  { %v279_v39 = vmul.f32 %v278_v28, %v276_v53  ;;  %v355_v33 = vadd.s32 %v917_v57, %v914_v54  ;;  %v457_v47 = vmul.u32 %v450_v2, %v441_v25  ;;  %v460_v49 = vadd.s32 1, %v979_v23 }
  0x7a   :  { %v626_v21 = vpop.eup %625  ;;  %vm588_vm15 = vcmp.lt.s32.totalorder %v587_v19, 0  ;;  %vm459_vm0 = vc.u32 %v985_v34, %v978_v22  ;;  %v513_v54 = vmul.f32 %v763_v6, %v763_v6  ;;  %vm198_vm1 = vcmp.lt.s32.totalorder %v773_v10, 0 }
  0x7b   :  { %v628_v40 = vpop.eup %627  ;;  %v192_v24 = vxor.u32 2147483648, %v626_v21  ;;  %v370_v45 = vsel %vm588_vm15, 0, %v587_v19  ;;  %v461_v59 = vsel %vm459_vm0, %v460_v49, %v979_v23  ;;  %v280_v60 = vxor.u32 2147483648, %v279_v39 }
  0x7c   :  { %v189_v30 = vxor.u32 2147483648, %v628_v40  ;;  %v371_v15 = vsub.s32 32, %v370_v45  ;;  %v372_v27 = vshll.u32 %v962_v32, %v370_v45  ;;  %v375_v38 = vsub.s32 4294967266, %v370_v45 }
  0x7d   :  { %v193_v35 = vsel %vm191_vm13, %v192_v24, %v628_v40  ;;  %v462_v46 = vadd.s32 %v461_v59, %v457_v47  ;;  %vm1004_vm2 = vcmp.le.f32.partialorder %v196_v14, 0.7853982  ;;  %v281_v1 = vsel %vm198_vm1, %v280_v60, %v279_v39 }
  0x7e   :  { %v190_v5 = vsel %vm188_vm12, %v626_v21, %v189_v30  ;;  %v373_v57 = vshrl.u32 %v355_v33, %v371_v15  ;;  %v376_v44 = vadd.s32 127, %v375_v38  ;;  %v284_v28 = vsel %vm1004_vm2, %v773_v10, %v281_v1 }
  0x7f   :  { %v194_v51 = vsel %vm187_vm14, %v190_v5, %v193_v35  ;;  %v463_v9 = vadd.s32 536870912, %v462_v46  ;;  %vm301_vm3 = vcmp.lt.s32.totalorder %v776_v11, 0  ;;  %vm1019_vm4 = vcmp.le.f32.partialorder %v299_v36, 0.7853982 }
  0x80   :  { %v195_v56 = vsel %vm185_vm11, nan, %v194_v51  ;;  %v374_v32 = vor.u32 %v373_v57, %v372_v27  ;;  %v377_v61 = vshll.u32 %v376_v44, 23  ;;  %v282_v4 = vsub.s32 4, %v889_v37 }
  0x81   :  { %v593_v55 = vadd.f32 -1.0, %v195_v56  ;;  %v1010_v50 = vshrl.u32 %v463_v9, 30  ;;  %629 = vcosq.f32 %v284_v28  ;;  %v385_v21 = vsub.s32 4, %v953_v43 }
  0x82   :  { %v378_v48 = vor.u32 4788187, %v377_v61  ;;  %v381_v63 = vcvt.s32.f32 %v374_v32  ;;  %631 = vsinq.f32 %v284_v28  ;;  %v283_v36 = vsel %vm198_vm1, %v282_v4, %v889_v37 }
  0x83   :  { %v509_v62 = vmul.f32 -0.24, %v593_v55  ;;  %v465_v2 = vshll.u32 %v1010_v50, 30  ;;  %v285_v23 = vsel %vm1004_vm2, 0, %v283_v36  ;;  %v458_v40 = vadd.s32 %v978_v22, %v985_v34 }
  0x84   :  { %v379_v58 = vand.u32 2147483647, %v378_v48  ;;  %v386_v24 = vsel %vm301_vm3, %v385_v21, %v953_v43  ;;  %v289_v37 = vand.u32 3, %v285_v23  ;;  %v522_v38 = vlaneseq }
  0x85   :  { %v1000_v0 = vadd.f32 %v513_v54, %v509_v62  ;;  %v466_v42 = vsub.s32 %v462_v46, %v465_v2  ;;  %v388_v39 = vsel %vm1019_vm4, 0, %v386_v24  ;;  %vm288_vm11 = vweird.f32 %v773_v10 }
  0x86   :  { %v382_v29 = vmul.f32 %v381_v63, %v379_v58  ;;  %vm294_vm6 = vcmp.eq.s32.totalorder %v289_v37, 2  ;;  %vm291_vm7 = vcmp.eq.s32.totalorder %v289_v37, 0  ;;  %v392_v43 = vand.u32 3, %v388_v39 }
  0x87   :  { %v468_v13 = vsub.s32 0, %v466_v42  ;;  %vm290_vm8 = vcmp.lt.s32.totalorder %v289_v37, 2  ;;  %v523_v60 = vshrl.u32 %v522_v38, 7  ;;  %vm1045_vm13 = vcmp.le.f32.partialorder %v402_v41, 0.7853982 }
  0x88   :  { %v383_v3 = vxor.u32 2147483648, %v382_v29  ;;  %vm394_vm9 = vcmp.eq.s32.totalorder %v392_v43, 0  ;;  %vm397_vm10 = vcmp.eq.s32.totalorder %v392_v43, 2  ;;  %vm393_vm12 = vcmp.lt.s32.totalorder %v392_v43, 2 }
  0x89   :  { %v590_v18 = vmin.u32 %v468_v13, %v466_v42  ;;  %vm404_vm14 = vcmp.lt.s32.totalorder %v860_v17, 0  ;;  %v488_v48 = vsub.s32 4, %v1010_v50  ;;  %v524_v10 = vadd.s32 8, %v523_v60 }
  0x8a   :  { %v384_v53 = vsel %vm301_vm3, %v383_v3, %v382_v29  ;;  %vm391_vm15 = vweird.f32 %v776_v11  ;;  %v525_v28 = vadd.s32 16, %v523_v60  ;;  %v535_v14 = vmul.u32 128, %v523_v60 }
  0x8b   :  { %v387_v16 = vsel %vm1019_vm4, %v776_v11, %v384_v53  ;;  %v470_v20 = vclz %v590_v18  ;;  %v630_v25 = vpop.eup %629  ;;  %v489_v58 = vsel %vm404_vm14, %v488_v48, %v1010_v50  ;;  %v536_v3 = vmul.u32 128, %v524_v10 }
  0x8c   :  { %633 = vcosq.f32 %v387_v16  ;;  %v632_v35 = vpop.eup %631  ;;  %v295_v45 = vxor.u32 2147483648, %v630_v25  ;;  %v491_v4 = vsel %vm1045_vm13, 0, %v489_v58  ;;  %v514_v53 = vmul.f32 %v765_v7, %v765_v7 }
  0x8d   :  { %635 = vsinq.f32 %v387_v16  ;;  %v591_v52 = vadd.s32 4294967294, %v470_v20  ;;  %v292_v22 = vxor.u32 2147483648, %v632_v35  ;;  %v495_v16 = vand.u32 3, %v491_v4 }
  0x8e   :  { %v296_v56 = vsel %vm294_vm6, %v295_v45, %v632_v35  ;;  %v537_v18 = vmul.u32 128, %v525_v28  ;;  %v526_v20 = vadd.s32 24, %v523_v60  ;;  %vm494_vm4 = vweird.f32 %v860_v17 }
  0x8f   :  { %vm592_vm5 = vcmp.lt.s32.totalorder %v591_v52, 0  ;;  %v293_v54 = vsel %vm291_vm7, %v630_v25, %v292_v22  ;;  %vm500_vm0 = vcmp.eq.s32.totalorder %v495_v16, 2  ;;  %vm497_vm3 = vcmp.eq.s32.totalorder %v495_v16, 0 }
  0x90   :  { %v473_v19 = vsel %vm592_vm5, 0, %v591_v52  ;;  %v297_v46 = vsel %vm290_vm8, %v293_v54, %v296_v56  ;;  %v515_v52 = vmul.f32 %v767_v8, %v767_v8  ;;  %vm496_vm5 = vcmp.lt.s32.totalorder %v495_v16, 2 }
  0x91   :  { %v474_v26 = vsub.s32 32, %v473_v19  ;;  %v475_v30 = vshll.u32 %v466_v42, %v473_v19  ;;  %v478_v12 = vsub.s32 4294967266, %v473_v19  ;;  %v298_v63 = vsel %vm288_vm11, nan, %v297_v46 }
  0x92   :  { %v594_v2 = vadd.f32 -1.0, %v298_v63  ;;  %v528_v42 = vand.u32 127, %v522_v38  ;;  %v538_v37 = vmul.u32 128, %v526_v20  ;;  %v516_v22 = vmul.f32 %v787_v31, %v787_v31 }
  0x93   :  { %v476_v33 = vshrl.u32 %v458_v40, %v474_v26  ;;  %v479_v5 = vadd.s32 127, %v478_v12 }
  0x94   :  { %v510_v11 = vmul.f32 -0.24, %v594_v2  ;;  %v539_v36 = vadd.s32 %v535_v14, %v528_v42  ;;  %v540_v50 = vadd.s32 %v536_v3, %v528_v42  ;;  %v541_v24 = vadd.s32 %v537_v18, %v528_v42 }
  0x95   :  { %v477_v34 = vor.u32 %v476_v33, %v475_v30  ;;  %v480_v49 = vshll.u32 %v479_v5, 23  ;;  %v542_v5 = vadd.s32 %v538_v37, %v528_v42 }
  0x96   :  { %v634_v47 = vpop.eup %633  ;;  %v518_v23 = vadd.f32 %v514_v53, %v510_v11  ;;  %vm543_vm1 = vcmp.lt.s32.totalorder %v539_v36, 2048  ;;  %vm544_vm2 = vcmp.lt.s32.totalorder %v540_v50, 2048  ;;  %vm545_vm6 = vcmp.lt.s32.totalorder %v541_v24, 2048 }
  0x97   :  { %v636_v51 = vpop.eup %635  ;;  %v481_v15 = vor.u32 4788187, %v480_v49  ;;  %v484_v27 = vcvt.s32.f32 %v477_v34  ;;  %v398_v44 = vxor.u32 2147483648, %v634_v47  ;;  %v547_v12 = vsel %vm543_vm1, %v1000_v0, 0.0 }
  0x98   :  { %v395_v57 = vxor.u32 2147483648, %v636_v51  ;;  %v548_v35 = vsel %vm544_vm2, %v518_v23, 0.0  ;;  %vm546_vm7 = vcmp.lt.s32.totalorder %v542_v5, 2048 }
  0x99   :  { %v482_v59 = vand.u32 2147483647, %v481_v15  ;;  %v399_v62 = vsel %vm397_vm10, %v398_v44, %v636_v51  ;;  %v551_v45 = vadd.f32 %v548_v35, %v547_v12 }
  0x9a   :  { %v396_v61 = vsel %vm394_vm9, %v634_v47, %v395_v57 }
  0x9b   :  { %v485_v55 = vmul.f32 %v484_v27, %v482_v59  ;;  %v400_v1 = vsel %vm393_vm12, %v396_v61, %v399_v62 }
  0x9c   :  { %v401_v29 = vsel %vm391_vm15, nan, %v400_v1 }
  0x9d   :  { %v486_v9 = vxor.u32 2147483648, %v485_v55  ;;  %v595_v13 = vadd.f32 -1.0, %v401_v29 }
  0x9f   :  { %v487_v6 = vsel %vm404_vm14, %v486_v9, %v485_v55  ;;  %v511_v21 = vmul.f32 -0.24, %v595_v13 }
  0xa0   :  { %v490_v41 = vsel %vm1045_vm13, %v860_v17, %v487_v6 }
  0xa1   :  { %637 = vcosq.f32 %v490_v41  ;;  %v519_v30 = vadd.f32 %v515_v52, %v511_v21 }
  0xa2   :  { %639 = vsinq.f32 %v490_v41 }
  0xa3   :  { %v549_v34 = vsel %vm545_vm6, %v519_v30, 0.0 }
  0xa4   :  { %v552_v49 = vadd.f32 %v551_v45, %v549_v34 }
  0xab   :  { %v638_v40 = vpop.eup %637 }
  0xac   :  { %v640_v19 = vpop.eup %639  ;;  %v501_v25 = vxor.u32 2147483648, %v638_v40 }
  0xad   :  { %v498_v7 = vxor.u32 2147483648, %v640_v19 }
  0xae   :  { %v502_v26 = vsel %vm500_vm0, %v501_v25, %v640_v19 }
  0xaf   :  { %v499_v8 = vsel %vm497_vm3, %v638_v40, %v498_v7 }
  0xb0   :  { %v503_v39 = vsel %vm496_vm5, %v499_v8, %v502_v26 }
  0xb1   :  { %v504_v33 = vsel %vm494_vm4, nan, %v503_v39 }
  0xb2   :  { %v596_v47 = vadd.f32 -1.0, %v504_v33 }
  0xb4   :  { %v512_v17 = vmul.f32 -0.24, %v596_v47 }
  0xb6   :  { %v520_v51 = vadd.f32 %v516_v22, %v512_v17 }
  0xb8   :  { %v550_v43 = vsel %vm546_vm7, %v520_v51, 0.0 }
  0xb9   :  { %v553_v0 = vadd.f32 %v552_v49, %v550_v43 }
  0xbb   :  { %556 = vst [vmem:[#allocation7] sm:$0xff] %v553_v0 }
  0xbc   :  { %696 = shalt.err (!%p693_p6)
}
  0xbd   :  { %s697_s12 = scalar_lea.hbm %s1080_s2, 128 }
  0xbe   :  { %p698_p7 = scmp.ne.s32.totalorder %s1080_s2, %s697_s12  ;;  %p701_p8 = scmp.lt.u32.totalorder %s697_s12, %s1080_s2 }
  0xc0   :  { %p703_p9 = pnand %p701_p8, %p698_p7 }
  0xc2   :  { %706 = shalt.err (!%p703_p9)
}
  0xc3   :  { %566 = dma.vmem_to_hbm [thread:$0]  %s564_s8, 128, %s1080_s2, [#allocation4]  }
  0xc4   :  { %711 = dma.done.wait [#allocation4], 128  }
  0xc5   :  { %712 = vsyncadd [#allocation4], 4294967168 }
  0xc6   :  { %570 = vsyncpa [#allocation3], 1 }
  0xc7   :  { %571 = vsyncpa [#allocation6], 1 }
  0xc8   :  { %572 = vsyncpa [#allocation4], 1 }

</bundles_post_ra>
